<compile_context>
chip_gen: v5e
topology: v5e:2x2
jax: 0.10.0
libtpu: 0.0.40
codegen_flags: <defaults>
</compile_context>

<pallas_src>
import math

import jax
import jax.numpy as jnp
from jax.experimental import pallas as pl
from jax.experimental.pallas import tpu as pltpu

# ----- config (small synthetic sizes, consistent with the module) -----
EMBED_DIM = 32
NUM_Q_HEADS = 4
NUM_KV_HEADS = 2
HEAD_DIM = EMBED_DIM // NUM_Q_HEADS            # 8
GROUP = NUM_Q_HEADS // NUM_KV_HEADS            # 2
MAX_POS = 64
BASE_THETA = 10000.0
BATCH = 2
SEQ = 8


def precompute_rope(head_dim, base_theta=10000.0, context_length=4096):
    k = jnp.arange(0, head_dim, 2, dtype=jnp.float32)[: head_dim // 2]
    inv_freq = 1.0 / (base_theta ** (k / head_dim))
    positions = jnp.arange(context_length, dtype=jnp.float32)
    angles = positions[:, None] * inv_freq[None, :]
    angles = jnp.concatenate([angles, angles], axis=-1)
    return jnp.cos(angles), jnp.sin(angles)


def _rotate_half_matrix(head_dim):
    """R such that (y @ R) == concat([-y[half:], y[:half]]) for a single head."""
    half = head_dim // 2
    eye = jnp.eye(half, dtype=jnp.float32)
    top = jnp.concatenate([jnp.zeros((half, half), jnp.float32), eye], axis=1)
    bot = jnp.concatenate([-eye, jnp.zeros((half, half), jnp.float32)], axis=1)
    return jnp.concatenate([top, bot], axis=0)      # (hd, hd)


def gqa_kernel(x_ref, pm_ref, wq_ref, wqr_ref, wk_ref, wkr_ref, wv_ref, wo_ref,
               cosq_ref, sinq_ref, cosk_ref, sink_ref, out_ref):
    x = x_ref[0]                     # (S, D) bf16
    pm = pm_ref[0]                   # (1, S) f32, 1.0 = attend
    S = x.shape[0]

    # Projections (bf16 MXU inputs, f32 accumulation). The 1/sqrt(hd) scale and the
    # rotate-half(+sign) permutation are already folded into wq / wqr / wkr.
    q  = jnp.dot(x, wq_ref[...],  preferred_element_type=jnp.float32)   # (S, Hq*hd)
    qr = jnp.dot(x, wqr_ref[...], preferred_element_type=jnp.float32)   # (S, Hq*hd)
    k  = jnp.dot(x, wk_ref[...],  preferred_element_type=jnp.float32)   # (S, Hkv*hd)
    kr = jnp.dot(x, wkr_ref[...], preferred_element_type=jnp.float32)   # (S, Hkv*hd)
    v  = jnp.dot(x, wv_ref[...],  preferred_element_type=jnp.float32)   # (S, Hkv*hd)

    # RoPE applied once over the full projected widths (f32 elementwise, no shuffles).
    q_rope = q * cosq_ref[...] + qr * sinq_ref[...]
    k_rope = k * cosk_ref[...] + kr * sink_ref[...]

    # Additive mask bias (built once per grid step / per batch):
    # -inf where key is padded OR strictly in the future, else 0.
    row = jax.lax.broadcasted_iota(jnp.int32, (S, S), 0)
    col = jax.lax.broadcasted_iota(jnp.int32, (S, S), 1)
    masked = jnp.logical_or(col > row, jnp.broadcast_to(pm < 0.5, (S, S)))
    bias = jnp.where(masked, -jnp.inf, 0.0).astype(jnp.float32)

    q16 = q_rope.astype(jnp.bfloat16)
    k16 = k_rope.astype(jnp.bfloat16)
    v16 = v.astype(jnp.bfloat16)
    wo = wo_ref[...]                 # (D, D) bf16

    # NOTE: if a query row is fully masked (all keys padded), softmax yields NaN —
    # identical to the PyTorch reference; not guarded here.
    out_acc = jnp.zeros((S, EMBED_DIM), jnp.float32)
    for h in range(NUM_Q_HEADS):
        kvh = h // GROUP
        qh = q16[:, h * HEAD_DIM:(h + 1) * HEAD_DIM]          # (S, hd)
        kh = k16[:, kvh * HEAD_DIM:(kvh + 1) * HEAD_DIM]      # (S, hd)
        vh = v16[:, kvh * HEAD_DIM:(kvh + 1) * HEAD_DIM]      # (S, hd)

        s = jnp.dot(qh, kh.T, preferred_element_type=jnp.float32) + bias  # (S, S)
        m = jnp.max(s, axis=-1, keepdims=True)
        e = jnp.exp(s - m)
        p = e * pl.reciprocal(jnp.sum(e, axis=-1, keepdims=True), approx=True)

        ph = jnp.dot(p.astype(jnp.bfloat16), vh, preferred_element_type=jnp.float32)
        # Accumulate the output projection per head (row-slice of Wo^T is a static,
        # sublane-dim slice) — avoids the lane-dim concat of head outputs.
        out_acc = out_acc + jnp.dot(
            ph.astype(jnp.bfloat16), wo[h * HEAD_DIM:(h + 1) * HEAD_DIM, :],
            preferred_element_type=jnp.float32)

    out_ref[0] = out_acc


def gqa_forward(x, attention_mask, Wq, Wk, Wv, Wo, cos, sin):
    """x: (B, S, D) f32; attention_mask: (B, S) bool; W*: (out, in) like nn.Linear."""
    B, S, D = x.shape
    scale = 1.0 / math.sqrt(HEAD_DIM)

    # Fold rotate-half (+sign) and scale into the projection weights.
    R = _rotate_half_matrix(HEAD_DIM)                                   # (hd, hd)
    Pq = jnp.kron(jnp.eye(NUM_Q_HEADS, dtype=jnp.float32), R)           # (Hq*hd, Hq*hd)
    Pk = jnp.kron(jnp.eye(NUM_KV_HEADS, dtype=jnp.float32), R)          # (Hkv*hd, Hkv*hd)

    wq_t = Wq.T * scale                  # (D, Hq*hd)
    wqr_t = (Wq.T @ Pq) * scale          # (D, Hq*hd)  -> x @ wqr_t == rotate_half(q) * scale
    wk_t = Wk.T                          # (D, Hkv*hd)
    wkr_t = Wk.T @ Pk                    # (D, Hkv*hd)
    wv_t = Wv.T                          # (D, Hkv*hd)
    wo_t = Wo.T                          # (D, D)

    cos_s = cos[:S]
    sin_s = sin[:S]
    cos_q = jnp.tile(cos_s, (1, NUM_Q_HEADS))       # (S, Hq*hd)
    sin_q = jnp.tile(sin_s, (1, NUM_Q_HEADS))
    cos_k = jnp.tile(cos_s, (1, NUM_KV_HEADS))      # (S, Hkv*hd)
    sin_k = jnp.tile(sin_s, (1, NUM_KV_HEADS))

    pm = attention_mask.astype(jnp.float32)[:, None, :]     # (B, 1, S)

    bf = jnp.bfloat16
    x16 = x.astype(bf)
    wq16, wqr16 = wq_t.astype(bf), wqr_t.astype(bf)
    wk16, wkr16 = wk_t.astype(bf), wkr_t.astype(bf)
    wv16, wo16 = wv_t.astype(bf), wo_t.astype(bf)

    HQD = NUM_Q_HEADS * HEAD_DIM
    HKD = NUM_KV_HEADS * HEAD_DIM

    return pl.pallas_call(
        gqa_kernel,
        out_shape=jax.ShapeDtypeStruct((B, S, D), jnp.float32),
        grid_spec=pltpu.PrefetchScalarGridSpec(
            num_scalar_prefetch=0,
            grid=(B,),
            in_specs=[
                pl.BlockSpec((1, S, D), lambda b: (b, 0, 0)),      # x (bf16)
                pl.BlockSpec((1, 1, S), lambda b: (b, 0, 0)),      # padding mask (f32)
                pl.BlockSpec((D, HQD), lambda b: (0, 0)),          # Wq^T * scale
                pl.BlockSpec((D, HQD), lambda b: (0, 0)),          # (Wq^T @ Pq) * scale
                pl.BlockSpec((D, HKD), lambda b: (0, 0)),          # Wk^T
                pl.BlockSpec((D, HKD), lambda b: (0, 0)),          # Wk^T @ Pk
                pl.BlockSpec((D, HKD), lambda b: (0, 0)),          # Wv^T
                pl.BlockSpec((D, D), lambda b: (0, 0)),            # Wo^T
                pl.BlockSpec((S, HQD), lambda b: (0, 0)),          # cos tiled for q
                pl.BlockSpec((S, HQD), lambda b: (0, 0)),          # sin tiled for q
                pl.BlockSpec((S, HKD), lambda b: (0, 0)),          # cos tiled for k
                pl.BlockSpec((S, HKD), lambda b: (0, 0)),          # sin tiled for k
            ],
            out_specs=pl.BlockSpec((1, S, D), lambda b: (b, 0, 0)),
        ),
        compiler_params=pltpu.CompilerParams(dimension_semantics=("parallel",)),
    )(x16, pm, wq16, wqr16, wk16, wkr16, wv16, wo16, cos_q, sin_q, cos_k, sin_k)


def reference_forward(x, attention_mask, Wq, Wk, Wv, Wo, cos, sin):
    """Pure-JAX f32 mirror of the PyTorch forward (eval mode, no KV cache)."""
    B, S, D = x.shape
    q = x @ Wq.T
    k = x @ Wk.T
    v = x @ Wv.T
    q = q.reshape(B, S, NUM_Q_HEADS, HEAD_DIM).transpose(0, 2, 1, 3)
    k = k.reshape(B, S, NUM_KV_HEADS, HEAD_DIM).transpose(0, 2, 1, 3)
    v = v.reshape(B, S, NUM_KV_HEADS, HEAD_DIM).transpose(0, 2, 1, 3)

    def rope4(t):
        half = HEAD_DIM // 2
        x1, x2 = t[..., :half], t[..., half:]
        rot = jnp.concatenate([-x2, x1], axis=-1)
        return t * cos[None, None, :S, :] + rot * sin[None, None, :S, :]

    q = rope4(q)
    k = rope4(k)
    k = jnp.repeat(k, GROUP, axis=1)
    v = jnp.repeat(v, GROUP, axis=1)
    attn = jnp.einsum("bhqd,bhkd->bhqk", q, k)
    cm = jnp.triu(jnp.ones((S, S), dtype=bool), k=1)
    mask = ~(attention_mask[:, None, None, :] & ~cm[None, None, :, :])
    attn = jnp.where(mask, -jnp.inf, attn)
    attn = jax.nn.softmax(attn / math.sqrt(HEAD_DIM), axis=-1)
    out = jnp.einsum("bhqk,bhkd->bhqd", attn, v)
    out = out.transpose(0, 2, 1, 3).reshape(B, S, D)
    return out @ Wo.T


if __name__ == "__main__":
    key = jax.random.PRNGKey(0)
    kx, kq, kk, kv, ko = jax.random.split(key, 5)

    x = jax.random.normal(kx, (BATCH, SEQ, EMBED_DIM), dtype=jnp.float32)
    # deterministic "nn.Linear"-style weights, shape (out_features, in_features)
    Wq = jax.random.normal(kq, (NUM_Q_HEADS * HEAD_DIM, EMBED_DIM), jnp.float32) * 0.05
    Wk = jax.random.normal(kk, (NUM_KV_HEADS * HEAD_DIM, EMBED_DIM), jnp.float32) * 0.05
    Wv = jax.random.normal(kv, (NUM_KV_HEADS * HEAD_DIM, EMBED_DIM), jnp.float32) * 0.05
    Wo = jax.random.normal(ko, (EMBED_DIM, EMBED_DIM), jnp.float32) * 0.05

    cos, sin = precompute_rope(HEAD_DIM, BASE_THETA, MAX_POS)

    # padding mask: batch 0 fully valid, batch 1 has last two tokens padded
    attention_mask = jnp.array(
        [[True] * SEQ, [True] * (SEQ - 2) + [False] * 2], dtype=bool
    )

    out = gqa_forward(x, attention_mask, Wq, Wk, Wv, Wo, cos, sin)
    out = jax.block_until_ready(out)

    ref = reference_forward(x, attention_mask, Wq, Wk, Wv, Wo, cos, sin)
    assert out.shape == (BATCH, SEQ, EMBED_DIM)
    err = float(jnp.max(jnp.abs(out - ref)))
    # Tolerance accounts for bf16 MXU operands + approx reciprocal vs f32 reference
    # (estimated max abs error << 1e-3; real bugs produce O(1e-1) deviations).
    assert err < 4e-3, f"max abs err = {err}"

    print("KERNEL_OK")
</pallas_src>

<mosaic_0001>
module attributes {stable_mosaic.version = 11 : i64} {
  func.func @gqa_kernel(%arg0: i32, %arg1: memref<1x8x32xbf16, #tpu.memory_space<vmem>>, %arg2: memref<1x1x8xf32, #tpu.memory_space<vmem>>, %arg3: memref<32x32xbf16, #tpu.memory_space<vmem>>, %arg4: memref<32x32xbf16, #tpu.memory_space<vmem>>, %arg5: memref<32x16xbf16, #tpu.memory_space<vmem>>, %arg6: memref<32x16xbf16, #tpu.memory_space<vmem>>, %arg7: memref<32x16xbf16, #tpu.memory_space<vmem>>, %arg8: memref<32x32xbf16, #tpu.memory_space<vmem>>, %arg9: memref<8x32xf32, #tpu.memory_space<vmem>>, %arg10: memref<8x32xf32, #tpu.memory_space<vmem>>, %arg11: memref<8x16xf32, #tpu.memory_space<vmem>>, %arg12: memref<8x16xf32, #tpu.memory_space<vmem>>, %arg13: memref<1x8x32xf32, #tpu.memory_space<vmem>>) attributes {dimension_semantics = [#tpu.dimension_semantics<parallel>], iteration_bounds = array<i64: 2>, scalar_prefetch = 0 : i64, scratch_operands = 0 : i64, tpu.core_type = #tpu.core_type<tc>, window_params = [{transform_indices = @transform_0, window_bounds = array<i64: 1, 8, 32>}, {transform_indices = @transform_1, window_bounds = array<i64: 1, 1, 8>}, {pipeline_mode = #tpu.pipeline_mode<synchronous>, transform_indices = @transform_2, window_bounds = array<i64: 32, 32>}, {pipeline_mode = #tpu.pipeline_mode<synchronous>, transform_indices = @transform_3, window_bounds = array<i64: 32, 32>}, {pipeline_mode = #tpu.pipeline_mode<synchronous>, transform_indices = @transform_4, window_bounds = array<i64: 32, 16>}, {pipeline_mode = #tpu.pipeline_mode<synchronous>, transform_indices = @transform_5, window_bounds = array<i64: 32, 16>}, {pipeline_mode = #tpu.pipeline_mode<synchronous>, transform_indices = @transform_6, window_bounds = array<i64: 32, 16>}, {pipeline_mode = #tpu.pipeline_mode<synchronous>, transform_indices = @transform_7, window_bounds = array<i64: 32, 32>}, {pipeline_mode = #tpu.pipeline_mode<synchronous>, transform_indices = @transform_8, window_bounds = array<i64: 8, 32>}, {pipeline_mode = #tpu.pipeline_mode<synchronous>, transform_indices = @transform_9, window_bounds = array<i64: 8, 32>}, {pipeline_mode = #tpu.pipeline_mode<synchronous>, transform_indices = @transform_10, window_bounds = array<i64: 8, 16>}, {pipeline_mode = #tpu.pipeline_mode<synchronous>, transform_indices = @transform_11, window_bounds = array<i64: 8, 16>}, {transform_indices = @transform_12, window_bounds = array<i64: 1, 8, 32>}]} {
    %c0 = arith.constant 0 : index
    %c0_0 = arith.constant 0 : index
    %c0_1 = arith.constant 0 : index
    %0 = vector.load %arg1[%c0, %c0_0, %c0_1] : memref<1x8x32xbf16, #tpu.memory_space<vmem>>, vector<1x8x32xbf16>
    %1 = vector.shape_cast %0 : vector<1x8x32xbf16> to vector<8x32xbf16>
    %c0_2 = arith.constant 0 : index
    %c0_3 = arith.constant 0 : index
    %c0_4 = arith.constant 0 : index
    %2 = vector.load %arg2[%c0_2, %c0_3, %c0_4] : memref<1x1x8xf32, #tpu.memory_space<vmem>>, vector<1x1x8xf32>
    %3 = vector.shape_cast %2 : vector<1x1x8xf32> to vector<1x8xf32>
    %c0_5 = arith.constant 0 : index
    %c0_6 = arith.constant 0 : index
    %4 = vector.load %arg3[%c0_5, %c0_6] : memref<32x32xbf16, #tpu.memory_space<vmem>>, vector<32x32xbf16>
    %cst = arith.constant dense<0.000000e+00> : vector<8x32xf32>
    %5 = tpu.matmul %1, %4, %cst {dimension_numbers = #tpu.dot_dimension_numbers<[1], [0], [0], [1], [0, 0, 1, 1], [], []>} : vector<8x32xbf16>, vector<32x32xbf16>, vector<8x32xf32> -> vector<8x32xf32>
    %c0_7 = arith.constant 0 : index
    %c0_8 = arith.constant 0 : index
    %6 = vector.load %arg4[%c0_7, %c0_8] : memref<32x32xbf16, #tpu.memory_space<vmem>>, vector<32x32xbf16>
    %cst_9 = arith.constant dense<0.000000e+00> : vector<8x32xf32>
    %7 = tpu.matmul %1, %6, %cst_9 {dimension_numbers = #tpu.dot_dimension_numbers<[1], [0], [0], [1], [0, 0, 1, 1], [], []>} : vector<8x32xbf16>, vector<32x32xbf16>, vector<8x32xf32> -> vector<8x32xf32>
    %c0_10 = arith.constant 0 : index
    %c0_11 = arith.constant 0 : index
    %8 = vector.load %arg5[%c0_10, %c0_11] : memref<32x16xbf16, #tpu.memory_space<vmem>>, vector<32x16xbf16>
    %cst_12 = arith.constant dense<0.000000e+00> : vector<8x16xf32>
    %9 = tpu.matmul %1, %8, %cst_12 {dimension_numbers = #tpu.dot_dimension_numbers<[1], [0], [0], [1], [0, 0, 1, 1], [], []>} : vector<8x32xbf16>, vector<32x16xbf16>, vector<8x16xf32> -> vector<8x16xf32>
    %c0_13 = arith.constant 0 : index
    %c0_14 = arith.constant 0 : index
    %10 = vector.load %arg6[%c0_13, %c0_14] : memref<32x16xbf16, #tpu.memory_space<vmem>>, vector<32x16xbf16>
    %cst_15 = arith.constant dense<0.000000e+00> : vector<8x16xf32>
    %11 = tpu.matmul %1, %10, %cst_15 {dimension_numbers = #tpu.dot_dimension_numbers<[1], [0], [0], [1], [0, 0, 1, 1], [], []>} : vector<8x32xbf16>, vector<32x16xbf16>, vector<8x16xf32> -> vector<8x16xf32>
    %c0_16 = arith.constant 0 : index
    %c0_17 = arith.constant 0 : index
    %12 = vector.load %arg7[%c0_16, %c0_17] : memref<32x16xbf16, #tpu.memory_space<vmem>>, vector<32x16xbf16>
    %cst_18 = arith.constant dense<0.000000e+00> : vector<8x16xf32>
    %13 = tpu.matmul %1, %12, %cst_18 {dimension_numbers = #tpu.dot_dimension_numbers<[1], [0], [0], [1], [0, 0, 1, 1], [], []>} : vector<8x32xbf16>, vector<32x16xbf16>, vector<8x16xf32> -> vector<8x16xf32>
    %c0_19 = arith.constant 0 : index
    %c0_20 = arith.constant 0 : index
    %14 = vector.load %arg9[%c0_19, %c0_20] : memref<8x32xf32, #tpu.memory_space<vmem>>, vector<8x32xf32>
    %15 = arith.mulf %5, %14 : vector<8x32xf32>
    %c0_21 = arith.constant 0 : index
    %c0_22 = arith.constant 0 : index
    %16 = vector.load %arg10[%c0_21, %c0_22] : memref<8x32xf32, #tpu.memory_space<vmem>>, vector<8x32xf32>
    %17 = arith.mulf %7, %16 : vector<8x32xf32>
    %18 = arith.addf %15, %17 : vector<8x32xf32>
    %c0_23 = arith.constant 0 : index
    %c0_24 = arith.constant 0 : index
    %19 = vector.load %arg11[%c0_23, %c0_24] : memref<8x16xf32, #tpu.memory_space<vmem>>, vector<8x16xf32>
    %20 = arith.mulf %9, %19 : vector<8x16xf32>
    %c0_25 = arith.constant 0 : index
    %c0_26 = arith.constant 0 : index
    %21 = vector.load %arg12[%c0_25, %c0_26] : memref<8x16xf32, #tpu.memory_space<vmem>>, vector<8x16xf32>
    %22 = arith.mulf %11, %21 : vector<8x16xf32>
    %23 = arith.addf %20, %22 : vector<8x16xf32>
    %24 = tpu.iota {dimensions = array<i32: 0>} : vector<8x8xi32>
    %25 = tpu.iota {dimensions = array<i32: 1>} : vector<8x8xi32>
    %26 = arith.cmpi sgt, %25, %24 : vector<8x8xi32>
    %cst_27 = arith.constant 5.000000e-01 : f32
    %27 = vector.broadcast %cst_27 : f32 to vector<1x8xf32>
    %28 = arith.cmpf olt, %3, %27 : vector<1x8xf32>
    %29 = vector.shape_cast %28 : vector<1x8xi1> to vector<1x8xi1>
    %30 = vector.broadcast %29 : vector<1x8xi1> to vector<8x8xi1>
    %31 = arith.ori %26, %30 : vector<8x8xi1>
    %cst_28 = arith.constant 0xFF800000 : f32
    %cst_29 = arith.constant 0.000000e+00 : f32
    %32 = vector.broadcast %cst_28 : f32 to vector<8x8xf32>
    %33 = vector.broadcast %cst_29 : f32 to vector<8x8xf32>
    %34 = arith.select %31, %32, %33 : vector<8x8xi1>, vector<8x8xf32>
    %35 = arith.truncf %18 : vector<8x32xf32> to vector<8x32xbf16>
    %36 = arith.truncf %23 : vector<8x16xf32> to vector<8x16xbf16>
    %37 = arith.truncf %13 : vector<8x16xf32> to vector<8x16xbf16>
    %c0_30 = arith.constant 0 : index
    %c0_31 = arith.constant 0 : index
    %38 = vector.load %arg8[%c0_30, %c0_31] : memref<32x32xbf16, #tpu.memory_space<vmem>>, vector<32x32xbf16>
    %cst_32 = arith.constant 0.000000e+00 : f32
    %39 = vector.broadcast %cst_32 : f32 to vector<8x32xf32>
    %40 = vector.extract_strided_slice %35 {offsets = [0, 0], sizes = [8, 8], strides = [1, 1]} : vector<8x32xbf16> to vector<8x8xbf16>
    %41 = vector.extract_strided_slice %36 {offsets = [0, 0], sizes = [8, 8], strides = [1, 1]} : vector<8x16xbf16> to vector<8x8xbf16>
    %42 = vector.extract_strided_slice %37 {offsets = [0, 0], sizes = [8, 8], strides = [1, 1]} : vector<8x16xbf16> to vector<8x8xbf16>
    %43 = tpu.transpose %41, [1, 0] : vector<8x8xbf16> -> vector<8x8xbf16>
    %cst_33 = arith.constant dense<0.000000e+00> : vector<8x8xf32>
    %44 = tpu.matmul %40, %43, %cst_33 {dimension_numbers = #tpu.dot_dimension_numbers<[1], [0], [0], [1], [0, 0, 1, 1], [], []>} : vector<8x8xbf16>, vector<8x8xbf16>, vector<8x8xf32> -> vector<8x8xf32>
    %45 = arith.addf %44, %34 : vector<8x8xf32>
    %cst_34 = arith.constant dense<0xFF800000> : vector<8xf32>
    %46 = vector.multi_reduction <maximumf>, %45, %cst_34 [1] : vector<8x8xf32> to vector<8xf32>
    %47 = vector.shape_cast %46 : vector<8xf32> to vector<8x1xf32>
    %48 = vector.broadcast %47 : vector<8x1xf32> to vector<8x8xf32>
    %49 = arith.subf %45, %48 : vector<8x8xf32>
    %50 = math.exp %49 : vector<8x8xf32>
    %cst_35 = arith.constant dense<0.000000e+00> : vector<8xf32>
    %51 = vector.multi_reduction <add>, %50, %cst_35 [1] : vector<8x8xf32> to vector<8xf32>
    %52 = vector.shape_cast %51 : vector<8xf32> to vector<8x1xf32>
    %53 = tpu.reciprocal %52 {approx = true} : vector<8x1xf32> -> vector<8x1xf32>
    %54 = vector.broadcast %53 : vector<8x1xf32> to vector<8x8xf32>
    %55 = arith.mulf %50, %54 : vector<8x8xf32>
    %56 = arith.truncf %55 : vector<8x8xf32> to vector<8x8xbf16>
    %cst_36 = arith.constant dense<0.000000e+00> : vector<8x8xf32>
    %57 = tpu.matmul %56, %42, %cst_36 {dimension_numbers = #tpu.dot_dimension_numbers<[1], [0], [0], [1], [0, 0, 1, 1], [], []>} : vector<8x8xbf16>, vector<8x8xbf16>, vector<8x8xf32> -> vector<8x8xf32>
    %58 = arith.truncf %57 : vector<8x8xf32> to vector<8x8xbf16>
    %59 = vector.extract_strided_slice %38 {offsets = [0, 0], sizes = [8, 32], strides = [1, 1]} : vector<32x32xbf16> to vector<8x32xbf16>
    %cst_37 = arith.constant dense<0.000000e+00> : vector<8x32xf32>
    %60 = tpu.matmul %58, %59, %cst_37 {dimension_numbers = #tpu.dot_dimension_numbers<[1], [0], [0], [1], [0, 0, 1, 1], [], []>} : vector<8x8xbf16>, vector<8x32xbf16>, vector<8x32xf32> -> vector<8x32xf32>
    %61 = arith.addf %39, %60 : vector<8x32xf32>
    %62 = vector.extract_strided_slice %35 {offsets = [0, 8], sizes = [8, 8], strides = [1, 1]} : vector<8x32xbf16> to vector<8x8xbf16>
    %63 = vector.extract_strided_slice %36 {offsets = [0, 0], sizes = [8, 8], strides = [1, 1]} : vector<8x16xbf16> to vector<8x8xbf16>
    %64 = vector.extract_strided_slice %37 {offsets = [0, 0], sizes = [8, 8], strides = [1, 1]} : vector<8x16xbf16> to vector<8x8xbf16>
    %65 = tpu.transpose %63, [1, 0] : vector<8x8xbf16> -> vector<8x8xbf16>
    %cst_38 = arith.constant dense<0.000000e+00> : vector<8x8xf32>
    %66 = tpu.matmul %62, %65, %cst_38 {dimension_numbers = #tpu.dot_dimension_numbers<[1], [0], [0], [1], [0, 0, 1, 1], [], []>} : vector<8x8xbf16>, vector<8x8xbf16>, vector<8x8xf32> -> vector<8x8xf32>
    %67 = arith.addf %66, %34 : vector<8x8xf32>
    %cst_39 = arith.constant dense<0xFF800000> : vector<8xf32>
    %68 = vector.multi_reduction <maximumf>, %67, %cst_39 [1] : vector<8x8xf32> to vector<8xf32>
    %69 = vector.shape_cast %68 : vector<8xf32> to vector<8x1xf32>
    %70 = vector.broadcast %69 : vector<8x1xf32> to vector<8x8xf32>
    %71 = arith.subf %67, %70 : vector<8x8xf32>
    %72 = math.exp %71 : vector<8x8xf32>
    %cst_40 = arith.constant dense<0.000000e+00> : vector<8xf32>
    %73 = vector.multi_reduction <add>, %72, %cst_40 [1] : vector<8x8xf32> to vector<8xf32>
    %74 = vector.shape_cast %73 : vector<8xf32> to vector<8x1xf32>
    %75 = tpu.reciprocal %74 {approx = true} : vector<8x1xf32> -> vector<8x1xf32>
    %76 = vector.broadcast %75 : vector<8x1xf32> to vector<8x8xf32>
    %77 = arith.mulf %72, %76 : vector<8x8xf32>
    %78 = arith.truncf %77 : vector<8x8xf32> to vector<8x8xbf16>
    %cst_41 = arith.constant dense<0.000000e+00> : vector<8x8xf32>
    %79 = tpu.matmul %78, %64, %cst_41 {dimension_numbers = #tpu.dot_dimension_numbers<[1], [0], [0], [1], [0, 0, 1, 1], [], []>} : vector<8x8xbf16>, vector<8x8xbf16>, vector<8x8xf32> -> vector<8x8xf32>
    %80 = arith.truncf %79 : vector<8x8xf32> to vector<8x8xbf16>
    %81 = vector.extract_strided_slice %38 {offsets = [8, 0], sizes = [8, 32], strides = [1, 1]} : vector<32x32xbf16> to vector<8x32xbf16>
    %cst_42 = arith.constant dense<0.000000e+00> : vector<8x32xf32>
    %82 = tpu.matmul %80, %81, %cst_42 {dimension_numbers = #tpu.dot_dimension_numbers<[1], [0], [0], [1], [0, 0, 1, 1], [], []>} : vector<8x8xbf16>, vector<8x32xbf16>, vector<8x32xf32> -> vector<8x32xf32>
    %83 = arith.addf %61, %82 : vector<8x32xf32>
    %84 = vector.extract_strided_slice %35 {offsets = [0, 16], sizes = [8, 8], strides = [1, 1]} : vector<8x32xbf16> to vector<8x8xbf16>
    %85 = vector.extract_strided_slice %36 {offsets = [0, 8], sizes = [8, 8], strides = [1, 1]} : vector<8x16xbf16> to vector<8x8xbf16>
    %86 = vector.extract_strided_slice %37 {offsets = [0, 8], sizes = [8, 8], strides = [1, 1]} : vector<8x16xbf16> to vector<8x8xbf16>
    %87 = tpu.transpose %85, [1, 0] : vector<8x8xbf16> -> vector<8x8xbf16>
    %cst_43 = arith.constant dense<0.000000e+00> : vector<8x8xf32>
    %88 = tpu.matmul %84, %87, %cst_43 {dimension_numbers = #tpu.dot_dimension_numbers<[1], [0], [0], [1], [0, 0, 1, 1], [], []>} : vector<8x8xbf16>, vector<8x8xbf16>, vector<8x8xf32> -> vector<8x8xf32>
    %89 = arith.addf %88, %34 : vector<8x8xf32>
    %cst_44 = arith.constant dense<0xFF800000> : vector<8xf32>
    %90 = vector.multi_reduction <maximumf>, %89, %cst_44 [1] : vector<8x8xf32> to vector<8xf32>
    %91 = vector.shape_cast %90 : vector<8xf32> to vector<8x1xf32>
    %92 = vector.broadcast %91 : vector<8x1xf32> to vector<8x8xf32>
    %93 = arith.subf %89, %92 : vector<8x8xf32>
    %94 = math.exp %93 : vector<8x8xf32>
    %cst_45 = arith.constant dense<0.000000e+00> : vector<8xf32>
    %95 = vector.multi_reduction <add>, %94, %cst_45 [1] : vector<8x8xf32> to vector<8xf32>
    %96 = vector.shape_cast %95 : vector<8xf32> to vector<8x1xf32>
    %97 = tpu.reciprocal %96 {approx = true} : vector<8x1xf32> -> vector<8x1xf32>
    %98 = vector.broadcast %97 : vector<8x1xf32> to vector<8x8xf32>
    %99 = arith.mulf %94, %98 : vector<8x8xf32>
    %100 = arith.truncf %99 : vector<8x8xf32> to vector<8x8xbf16>
    %cst_46 = arith.constant dense<0.000000e+00> : vector<8x8xf32>
    %101 = tpu.matmul %100, %86, %cst_46 {dimension_numbers = #tpu.dot_dimension_numbers<[1], [0], [0], [1], [0, 0, 1, 1], [], []>} : vector<8x8xbf16>, vector<8x8xbf16>, vector<8x8xf32> -> vector<8x8xf32>
    %102 = arith.truncf %101 : vector<8x8xf32> to vector<8x8xbf16>
    %103 = vector.extract_strided_slice %38 {offsets = [16, 0], sizes = [8, 32], strides = [1, 1]} : vector<32x32xbf16> to vector<8x32xbf16>
    %cst_47 = arith.constant dense<0.000000e+00> : vector<8x32xf32>
    %104 = tpu.matmul %102, %103, %cst_47 {dimension_numbers = #tpu.dot_dimension_numbers<[1], [0], [0], [1], [0, 0, 1, 1], [], []>} : vector<8x8xbf16>, vector<8x32xbf16>, vector<8x32xf32> -> vector<8x32xf32>
    %105 = arith.addf %83, %104 : vector<8x32xf32>
    %106 = vector.extract_strided_slice %35 {offsets = [0, 24], sizes = [8, 8], strides = [1, 1]} : vector<8x32xbf16> to vector<8x8xbf16>
    %107 = vector.extract_strided_slice %36 {offsets = [0, 8], sizes = [8, 8], strides = [1, 1]} : vector<8x16xbf16> to vector<8x8xbf16>
    %108 = vector.extract_strided_slice %37 {offsets = [0, 8], sizes = [8, 8], strides = [1, 1]} : vector<8x16xbf16> to vector<8x8xbf16>
    %109 = tpu.transpose %107, [1, 0] : vector<8x8xbf16> -> vector<8x8xbf16>
    %cst_48 = arith.constant dense<0.000000e+00> : vector<8x8xf32>
    %110 = tpu.matmul %106, %109, %cst_48 {dimension_numbers = #tpu.dot_dimension_numbers<[1], [0], [0], [1], [0, 0, 1, 1], [], []>} : vector<8x8xbf16>, vector<8x8xbf16>, vector<8x8xf32> -> vector<8x8xf32>
    %111 = arith.addf %110, %34 : vector<8x8xf32>
    %cst_49 = arith.constant dense<0xFF800000> : vector<8xf32>
    %112 = vector.multi_reduction <maximumf>, %111, %cst_49 [1] : vector<8x8xf32> to vector<8xf32>
    %113 = vector.shape_cast %112 : vector<8xf32> to vector<8x1xf32>
    %114 = vector.broadcast %113 : vector<8x1xf32> to vector<8x8xf32>
    %115 = arith.subf %111, %114 : vector<8x8xf32>
    %116 = math.exp %115 : vector<8x8xf32>
    %cst_50 = arith.constant dense<0.000000e+00> : vector<8xf32>
    %117 = vector.multi_reduction <add>, %116, %cst_50 [1] : vector<8x8xf32> to vector<8xf32>
    %118 = vector.shape_cast %117 : vector<8xf32> to vector<8x1xf32>
    %119 = tpu.reciprocal %118 {approx = true} : vector<8x1xf32> -> vector<8x1xf32>
    %120 = vector.broadcast %119 : vector<8x1xf32> to vector<8x8xf32>
    %121 = arith.mulf %116, %120 : vector<8x8xf32>
    %122 = arith.truncf %121 : vector<8x8xf32> to vector<8x8xbf16>
    %cst_51 = arith.constant dense<0.000000e+00> : vector<8x8xf32>
    %123 = tpu.matmul %122, %108, %cst_51 {dimension_numbers = #tpu.dot_dimension_numbers<[1], [0], [0], [1], [0, 0, 1, 1], [], []>} : vector<8x8xbf16>, vector<8x8xbf16>, vector<8x8xf32> -> vector<8x8xf32>
    %124 = arith.truncf %123 : vector<8x8xf32> to vector<8x8xbf16>
    %125 = vector.extract_strided_slice %38 {offsets = [24, 0], sizes = [8, 32], strides = [1, 1]} : vector<32x32xbf16> to vector<8x32xbf16>
    %cst_52 = arith.constant dense<0.000000e+00> : vector<8x32xf32>
    %126 = tpu.matmul %124, %125, %cst_52 {dimension_numbers = #tpu.dot_dimension_numbers<[1], [0], [0], [1], [0, 0, 1, 1], [], []>} : vector<8x8xbf16>, vector<8x32xbf16>, vector<8x32xf32> -> vector<8x32xf32>
    %127 = arith.addf %105, %126 : vector<8x32xf32>
    %c0_53 = arith.constant 0 : index
    %c0_54 = arith.constant 0 : index
    %c0_55 = arith.constant 0 : index
    %128 = vector.load %arg13[%c0_53, %c0_54, %c0_55] : memref<1x8x32xf32, #tpu.memory_space<vmem>>, vector<1x8x32xf32>
    %129 = vector.shape_cast %128 : vector<1x8x32xf32> to vector<8x32xf32>
    %130 = vector.shape_cast %127 : vector<8x32xf32> to vector<1x8x32xf32>
    tpu.vector_store %arg13[%c0_53, %c0_54, %c0_55], %130 {strides = array<i32>} : memref<1x8x32xf32, #tpu.memory_space<vmem>>, vector<1x8x32xf32>,
    return
  }
  func.func @transform_0(%arg0: i32) -> (i32, i32, i32) {
    %c0_i32 = arith.constant 0 : i32
    %c0_i32_0 = arith.constant 0 : i32
    %c0_i32_1 = arith.constant 0 : i32
    return %arg0, %c0_i32, %c0_i32_0 : i32, i32, i32
  }
  func.func @transform_1(%arg0: i32) -> (i32, i32, i32) {
    %c0_i32 = arith.constant 0 : i32
    %c0_i32_0 = arith.constant 0 : i32
    %c0_i32_1 = arith.constant 0 : i32
    return %arg0, %c0_i32, %c0_i32_0 : i32, i32, i32
  }
  func.func @transform_2(%arg0: i32) -> (i32, i32) {
    %c0_i32 = arith.constant 0 : i32
    %c0_i32_0 = arith.constant 0 : i32
    %c0_i32_1 = arith.constant 0 : i32
    return %c0_i32, %c0_i32_0 : i32, i32
  }
  func.func @transform_3(%arg0: i32) -> (i32, i32) {
    %c0_i32 = arith.constant 0 : i32
    %c0_i32_0 = arith.constant 0 : i32
    %c0_i32_1 = arith.constant 0 : i32
    return %c0_i32, %c0_i32_0 : i32, i32
  }
  func.func @transform_4(%arg0: i32) -> (i32, i32) {
    %c0_i32 = arith.constant 0 : i32
    %c0_i32_0 = arith.constant 0 : i32
    %c0_i32_1 = arith.constant 0 : i32
    return %c0_i32, %c0_i32_0 : i32, i32
  }
  func.func @transform_5(%arg0: i32) -> (i32, i32) {
    %c0_i32 = arith.constant 0 : i32
    %c0_i32_0 = arith.constant 0 : i32
    %c0_i32_1 = arith.constant 0 : i32
    return %c0_i32, %c0_i32_0 : i32, i32
  }
  func.func @transform_6(%arg0: i32) -> (i32, i32) {
    %c0_i32 = arith.constant 0 : i32
    %c0_i32_0 = arith.constant 0 : i32
    %c0_i32_1 = arith.constant 0 : i32
    return %c0_i32, %c0_i32_0 : i32, i32
  }
  func.func @transform_7(%arg0: i32) -> (i32, i32) {
    %c0_i32 = arith.constant 0 : i32
    %c0_i32_0 = arith.constant 0 : i32
    %c0_i32_1 = arith.constant 0 : i32
    return %c0_i32, %c0_i32_0 : i32, i32
  }
  func.func @transform_8(%arg0: i32) -> (i32, i32) {
    %c0_i32 = arith.constant 0 : i32
    %c0_i32_0 = arith.constant 0 : i32
    %c0_i32_1 = arith.constant 0 : i32
    return %c0_i32, %c0_i32_0 : i32, i32
  }
  func.func @transform_9(%arg0: i32) -> (i32, i32) {
    %c0_i32 = arith.constant 0 : i32
    %c0_i32_0 = arith.constant 0 : i32
    %c0_i32_1 = arith.constant 0 : i32
    return %c0_i32, %c0_i32_0 : i32, i32
  }
  func.func @transform_10(%arg0: i32) -> (i32, i32) {
    %c0_i32 = arith.constant 0 : i32
    %c0_i32_0 = arith.constant 0 : i32
    %c0_i32_1 = arith.constant 0 : i32
    return %c0_i32, %c0_i32_0 : i32, i32
  }
  func.func @transform_11(%arg0: i32) -> (i32, i32) {
    %c0_i32 = arith.constant 0 : i32
    %c0_i32_0 = arith.constant 0 : i32
    %c0_i32_1 = arith.constant 0 : i32
    return %c0_i32, %c0_i32_0 : i32, i32
  }
  func.func @transform_12(%arg0: i32) -> (i32, i32, i32) {
    %c0_i32 = arith.constant 0 : i32
    %c0_i32_0 = arith.constant 0 : i32
    %c0_i32_1 = arith.constant 0 : i32
    return %arg0, %c0_i32, %c0_i32_0 : i32, i32, i32
  }
}

</mosaic_0001>

<bundles_post_ra>
// kernel: tpu_custom_call.1
= control target key start
LH: loop header
LB: loop body
LE: loop exit
PB: predicated region body
PF: predicated region fallthrough
CT: control target
= control target key end

     0   :  { %s1791_s0 = inlined_call_operand.vmem [shape: bf16[2,8,32], index: 0, kind: input, shape index: {}]   ;;  %s1792_s1 = inlined_call_operand.hbm [shape: f32[2,1,8], index: 1, kind: input, shape index: {}]   ;;  %s1793_s2 = inlined_call_operand.vmem [shape: bf16[32,32], index: 2, kind: input, shape index: {}]   ;;  %s1794_s3 = inlined_call_operand.vmem [shape: bf16[32,32], index: 3, kind: input, shape index: {}]   ;;  %s1795_s4 = inlined_call_operand.vmem [shape: bf16[32,16], index: 4, kind: input, shape index: {}]   ;;  %s1796_s5 = inlined_call_operand.vmem [shape: bf16[32,16], index: 5, kind: input, shape index: {}]   ;;  %s1797_s6 = inlined_call_operand.vmem [shape: bf16[32,16], index: 6, kind: input, shape index: {}]   ;;  %s1798_s7 = inlined_call_operand.vmem [shape: bf16[32,32], index: 7, kind: input, shape index: {}]   ;;  %s1799_s8 = inlined_call_operand.hbm [shape: f32[8,32], index: 8, kind: input, shape index: {}]   ;;  %s1800_s9 = inlined_call_operand.vmem [shape: f32[8,32], index: 9, kind: input, shape index: {}]   ;;  %s1801_s10 = inlined_call_operand.hbm [shape: f32[8,16], index: 10, kind: input, shape index: {}]   ;;  %s1802_s11 = inlined_call_operand.hbm [shape: f32[8,16], index: 11, kind: input, shape index: {}]   ;;  %s1803_s12 = inlined_call_operand.hbm [shape: f32[2,8,32], index: 12, kind: output, shape index: {}]  }
   0x1   :  { %1805 = sst [smem:[#allocation17_spill]] %s1799_s8 }
   0x2   :  { %1806 = sst [smem:[#allocation18_spill]] %s1801_s10 }
   0x3   :  { %1807 = sst [smem:[#allocation19_spill]] %s1802_s11 }
   0x4   :  { %17 = vsyncpa [#allocation3], 0 }
   0x5   :  { %19 = vsyncpa [#allocation3 + $0x1], 0 }
   0x6   :  { %20 = vsyncpa [#allocation6], 0 }
   0x7   :  { %21 = vsyncpa [#allocation9], 0 }
   0x8   :  { %22 = vsyncpa [#allocation4], 0 }
   0x9   :  { %24 = vsyncpa [#allocation4 + $0x1], 0  ;;  %s1533_s21 = smov 0   ;;  %s1535_s22 = smov 0  }
   0xa   :  { %s1537_s23 = smov 0   ;;  %s1539_s24 = smov 0  }
   0xb LB: > { %1808 = sst [smem:[#allocation15_spill]] %s1454_s23  ;;  %s1554_s25 = sadd.s32 4294967295, %s1458_s24   ;;  %s1458_s24 = sphi %s1539_s24, %s1823_s24   ;;  %s1454_s23 = sphi %s1537_s23, %s1820_s23   ;;  %s1450_s22 = sphi %s1535_s22, %s1822_s22   ;;  %s1446_s21 = sphi %s1533_s21, %s1821_s21  }
   0xc   : > { %s1083_s26 = sadd.s32 4294967294, %s1458_s24   ;;  %p76_p0 = scmp.ne.s32.totalorder %s1450_s22, %s1446_s21 }
   0xd   : > { %p77_p1 = scmp.eq.s32.totalorder %s1554_s25, 0  ;;  %p310_p2 = scmp.eq.s32.totalorder %s1554_s25, 1 }
   0xe   : > { %p316_p3 = scmp.eq.s32.totalorder %s1083_s26, 1  ;;  %p1084_p5 = scmp.ge.s32.totalorder %s1458_s24, 1 }
   0xf   : > { %p1563_p4 = por %p77_p1, %p76_p0  ;;  %p323_p7 = scmp.lt.s32.totalorder %s1458_s24, 3 }
  0x10   : > { %p1568_p6 = por %p316_p3, %p76_p0  ;;  %s1811_s8 = sld [smem:[#allocation17_spill]] }
  0x11   : > { %p1576_p8 = pnand %p1084_p5, %p323_p7  ;;  %s1460_s15 = smov [#allocation5]  }
  0x12   : > { %s355_s16 = sshll.u32 %s1460_s15, 4  ;;  %s1813_s10 = sld [smem:[#allocation18_spill]]  ;;  %s356_s16 = int_to_ptr.vmem [resolvable:$true] %s355_s16 }
  0x13   : > { %p1182_p10 = pneg %p1576_p8  ;;  %s1814_s11 = sld [smem:[#allocation19_spill]] }
  0x14   : > { %s1461_s30 = smov [#allocation7]   ;;  %s1462_s17 = smov [#allocation8]  }
  0x15   : > { %p1183_p11 = pnand %p1182_p10, %p77_p1  ;;  %s370_s15 = sshll.u32 %s1461_s30, 4  ;;  %s371_s15 = int_to_ptr.vmem [resolvable:$true] %s370_s15 }
  0x16   : > { %s353_s13 = sshll.u32 %s1811_s8, 4  ;;  %s382_s18 = sshll.u32 %s1462_s17, 4  ;;  %s354_s13 = int_to_ptr.hbm [resolvable:$true] %s353_s13  ;;  %s383_s18 = int_to_ptr.vmem [resolvable:$true] %s382_s18 }
  0x17   : > { %1185 = dma.hbm_to_vmem [thread:$0]  (!%p1183_p11), %s354_s13, 128, %s356_s16, [#allocation6]  }
  0x18   : > { %s368_s19 = sshll.u32 %s1813_s10, 4  ;;  %s1592_s8 = sadd.s32 1, %s1458_s24   ;;  %s369_s19 = int_to_ptr.hbm [resolvable:$true] %s368_s19 }
  0x19   : > { %s380_s29 = sshll.u32 %s1814_s11, 4  ;;  %s60_s20 = ssub.s32 %s1458_s24, %s1592_s8  ;;  %s381_s29 = int_to_ptr.hbm [resolvable:$true] %s380_s29 }
  0x1a   : > { %1188 = dma.hbm_to_vmem [thread:$0]  (!%p1183_p11), %s369_s19, 128, %s371_s15, [#allocation6]  }
  0x1b   : > { %1191 = dma.hbm_to_vmem [thread:$0]  (!%p1183_p11), %s381_s29, 128, %s383_s18, [#allocation9]  }
  0x1c   : > { %s63_s26 = sadd.s32 1, %s1454_s23  ;;  %p61_p12 = scmp.eq.s32.totalorder %s60_s20, 0 }
  0x1d   : > { %p70_p13 = scmp.ne.s32.totalorder %s1454_s23, %s1450_s22  ;;  %p71_p0 = scmp.eq.s32.totalorder %s1458_s24, 0 }
  0x1e   : > { %p1203_p3 = scmp.lt.s32.totalorder %s1458_s24, 2  ;;  %s400_s19 = sand.u32 1, %s1454_s23  }
  0x1f   : > { %s1602_s13 = scalar_select %p61_p12, %s1454_s23, %s63_s26  }
  0x20   : > { %p72_p5 = por %p71_p0, %p70_p13  ;;  %p1606_p7 = por %p310_p2, %p70_p13 }
  0x21   : > { %1815 = sst [smem:[#allocation16_spill]] %s1602_s13  ;;  %s406_s17 = scalar_lea.hbm %s1792_s1, %s1458_s24 }
  0x22   : > { %s408_s29 = sshll.u32 %s406_s17, 4  ;;  %s403_s18 = scalar_lea.vmem [#allocation2], %s400_s19  ;;  %s409_s29 = int_to_ptr.hbm [resolvable:$true] %s408_s29 }
  0x23   : > { %s410_s10 = sshll.u32 %s403_s18, 4  ;;  %p1615_p10 = pnand %p1203_p3, %p72_p5  ;;  %s411_s10 = int_to_ptr.vmem [resolvable:$true] %s410_s10 }
  0x24   : > { %s401_s26 = scalar_lea.sflag [#allocation3], %s400_s19  ;;  %s1354_s11 = sshra.s32 %s409_s29, 4  ;;  %s1355_s11 = int_to_ptr.hbm [resolvable:$true] %s1354_s11 }
  0x25   : > { %s1356_s13 = scalar_lea.hbm %s1355_s11, 1  ;;  %p1358_p11 = pneg %p1615_p10 }
  0x26   : > { %p1357_p2 = scmp.ne.s32.totalorder %s1355_s11, %s1356_s13  ;;  %s1361_s17 = scalar_lea.hbm %s1792_s1, 2 }
  0x27   : > { %p1362_p0 = scmp.lt.s32.totalorder %s1355_s11, %s1792_s1  ;;  %p1363_p3 = scmp.lt.s32.totalorder %s1361_s17, %s1356_s13 }
  0x28   : > { %p1359_p12 = pnand %p1358_p11, %p1357_p2 }
  0x29   : > { %p1364_p5 = por %p1363_p3, %p1362_p0 }
  0x2a   : > { %p1360_p13 = pneg %p1359_p12 }
  0x2c   : > { %p1365_p9 = pnand %p1364_p5, %p1360_p13 }
  0x2e   : > { %1368 = shalt.err (!%p1365_p9)
}
  0x2f   : > { %1195 = dma.hbm_to_vmem [thread:$0]  (!%p1615_p10), %s409_s29, 16, %s411_s10, %s401_s26  }
  0x30   : > { %419 = sbr.rel (%p1576_p8) target bundleno = 1419 (0x58b), region = 68  ;;  %s1632_s19 = sand.u32 (!%p1576_p8), 1, %s1450_s22  }
  0x31   : > { %s422_s30 = scalar_lea.sflag (!%p1576_p8), [#allocation3], %s1632_s19  ;;  %s424_s15 = scalar_lea.vmem (!%p1576_p8), [#allocation2], %s1632_s19 }
  0x35   : > { %1429 = dma.done.wait (%p1563_p4), %s422_s30, 16  }
  0x36   : > { %1431 = vsyncadd (%p1563_p4), %s422_s30, 4294967280 }
  0x37   : > { %1433 = dma.done.wait (%p77_p1), [#allocation6], 256  }
  0x38   : > { %1435 = vsyncadd (%p77_p1), [#allocation6], 4294967040 }
  0x39   : > { %1437 = dma.done.wait (%p77_p1), [#allocation9], 128  }
  0x3a   : > { %1439 = vsyncadd (%p77_p1), [#allocation9], 4294967168  ;;  %p484_p8 = scmp.lt.s32.totalorder %s1554_s25, 1  ;;  %v1157_v0 = vld [vmem:[%s1793_s2 + $0x8] sm:$0xff]  ;;  %v1156_v4 = vld [vmem:[%s1793_s2] sm:$0xff]  ;;  %vm507_vm0 = vcmask 261120   ;;  %v650_v37 = vlaneseq }
  0x3b   : > { %v1159_v1 = vld [vmem:[%s1794_s3 + $0x8] sm:$0xff]  ;;  %517 = vmatpush.bf16.msra.mxu0 %v1157_v0  ;;  %v1158_v5 = vld [vmem:[%s1794_s3] sm:$0xff]  ;;  %v647_v18 = vld [vmem:[#allocation8] sm:$0xff]  ;;  %s1463_s30 = smov 120   ;;  %vm668_vm1 = vcmask 64512   ;;  %s1464_s11 = smov 104  }
  0x3c   : > { %s485_s10 = scalar_select %p484_p8, %s1554_s25, 1  ;;  %v1161_v2 = vld [vmem:[%s1795_s4 + $0x8] sm:$0xff]  ;;  %546 = vmatpush.bf16.msra.mxu1 %v1159_v1  ;;  %v1160_v6 = vld [vmem:[%s1795_s4] sm:$0xff]  ;;  %v1466_v38 = vmov 0   ;;  %v651_v42 = vshrl.u32 %v650_v37, 7  ;;  %v653_v43 = vand.u32 127, %v650_v37 }
  0x3d   : > { %v1163_v3 = vld [vmem:[%s1796_s5 + $0x8] sm:$0xff]  ;;  %575 = vmatpush.bf16.msra.mxu2 %v1161_v2  ;;  %v1162_v7 = vld [vmem:[%s1796_s5] sm:$0xff]  ;;  %s1465_s23 = smov 112   ;;  %v1467_v46 = vmov 0.0   ;;  %vm703_vm6 = vcmask 1043456  }
  0x3e   : > { %s1094_s20 = sshll.u32 %s485_s10, 2  ;;  %604 = vmatpush.bf16.msra.mxu3 %v1163_v3  ;;  %v640_v9 = vld [vmem:[#allocation5] sm:$0xff]  ;;  %v645_v17 = vld [vmem:[#allocation7] sm:$0xff]  ;;  %v490_v35 = vld [vmem:[%s424_s15] sm:$0x1]  ;;  %vm654_vm3 = vcmp.gt.s32.totalorder %v653_v43, %v651_v42  ;;  %s1093_s15 = sshll.u32 %s1632_s19, 3 }
  0x3f   : > { %s487_s17 = scalar_lea.vmem %s1791_s0, %s1094_s20  ;;  %518 = vmatpush.bf16.msra.mxu0 %v1156_v4  ;;  %v642_v10 = vld [vmem:[%s1800_s9] sm:$0xff]  ;;  %vm655_vm2 = vcmp.lt.f32.partialorder %v490_v35, 0.5  ;;  %v1165_v52 = vld [vmem:[%s1797_s6 + $0x8] sm:$0xff]  ;;  %s483_s13 = scalar_lea.vmem [#allocation10], %s1093_s15 }
  0x40   : > { %547 = vmatpush.bf16.msra.mxu1 %v1158_v5  ;;  %v1677_v8 = vld [vmem:[%s487_s17] sm:$0xf]  ;;  %v656_v39 = vsel %vm655_vm2, 1, %v1466_v38  ;;  %s973_s29 = sshll.u32 %s483_s13, 4  ;;  %s974_s29 = int_to_ptr.vmem [resolvable:$true] %s973_s29 }
  0x41   : > { %576 = vmatpush.bf16.msra.mxu2 %v1160_v6  ;;  %v657_v44 = vperm.slane %v656_v39, 0  ;;  %v1164_v53 = vld [vmem:[%s1797_s6] sm:$0xff] }
  0x42   : > { %605 = vmatpush.bf16.msra.mxu3 %v1162_v7  ;;  %1103 = vmatmul.msk.bf16.vlgmr.msra.gmra.mxu0 %vm507_vm0, %v1677_v8  ;;  %v664_v7 = vld [vmem:[%s1798_s7] sm:$0xf] }
  0x43   : > { %1112 = vmatmul.msk.bf16.vlgmr.msra.gmra.mxu1 %vm507_vm0, %v1677_v8  ;;  %vm658_vm4 = vcmp.eq.s32.totalorder %v657_v44, 1  ;;  %633 = vmatpush.bf16.msrb.mxu0 %v1165_v52 }
  0x44   : > { %1121 = vmatmul.msk.bf16.vlgmr.msra.gmra.mxu2 %vm507_vm0, %v1677_v8  ;;  %vm659_vm5 = vmor %vm654_vm3, %vm658_vm4 }
  0x45   : > { %1130 = vmatmul.msk.bf16.vlgmr.msra.gmra.mxu3 %vm507_vm0, %v1677_v8  ;;  %v1701_v47 = vsel %vm659_vm5, -inf, %v1467_v46 }
  0x47   : > { %634 = vmatpush.bf16.msrb.mxu0 %v1164_v53 }
  0x52   : > { %1139 = vmatmul.msk.bf16.vlgmr.msrb.gmra.mxu0 %vm507_vm0, %v1677_v8  ;;  %v794_v8 = vsel %vm703_vm6, %v664_v7, 0 }
  0xbf   : > { %v520_v11 = vpop.f32.mrf.mxu0 }
  0xc0   : > { %v549_v12 = vpop.f32.mrf.mxu1  ;;  %v641_v13 = vmul.f32 %v640_v9, %v520_v11 }
  0xc1   : > { %v643_v14 = vmul.f32 %v642_v10, %v549_v12 }
  0xc3   : > { %v644_v15 = vadd.f32 %v643_v14, %v641_v13 }
  0xc5   : > { %v661_v16 = vpack.c.bf16 %v644_v15, %v644_v15 }
  0xc7   : > { %v578_v19 = vpop.f32.mrf.mxu2  ;;  %v722_v21 = vunpack.c.l.b16 %v661_v16  ;;  %v522_v24 = vpop.f32.mrf.mxu0 }
  0xc8   : > { %v607_v20 = vpop.f32.mrf.mxu3  ;;  %v646_v22 = vmul.f32 %v645_v17, %v578_v19  ;;  %v551_v25 = vpop.f32.mrf.mxu1 }
  0xc9   : > { %v648_v23 = vmul.f32 %v647_v18, %v607_v20  ;;  %v723_v26 = vpack.c.b16 %v722_v21, %v722_v21 }
  0xcb   : > { %v649_v27 = vadd.f32 %v648_v23, %v646_v22  ;;  %724 = vrot.lane.b32.xlu1 %v723_v26, %s1463_s30  ;;  %892 = vrot.lane.b32.xlu2 %v723_v26, %s1464_s11  ;;  %s1404_s11 = scalar_lea.hbm %s1803_s12, 16 }
  0xcd   : > { %v662_v28 = vpack.c.bf16 %v649_v27, %v649_v27 }
  0xcf   : > { %v673_v29 = vsel %vm668_vm1, %v662_v28, 0  ;;  %v812_v30 = vunpack.c.l.b16 %v662_v28  ;;  %v580_v31 = vpop.f32.mrf.mxu2  ;;  %v636_v3 = vpop.f32.mrf.mxu0 }
  0xd0   : > { %v609_v32 = vpop.f32.mrf.mxu3  ;;  %682 = vmatpush.bf16.xpose.msrb.mxu1 %v673_v29  ;;  %736 = vmatpush.bf16.xpose.msrb.mxu3 %v673_v29  ;;  %v1718_v4 = vpack.c.bf16 %v636_v3, %v636_v3 }
  0xd1   : > { %v813_v33 = vpack.c.b16 %v812_v30, %v812_v30  ;;  %v665_v30 = vld [vmem:[%s1798_s7 + $0x4] sm:$0xf] }
  0xd2   : > { %v705_v6 = vsel %vm703_vm6, %v1718_v4, 0  ;;  %v775_v31 = vsel %vm703_vm6, %v665_v30, 0 }
  0xd3   : > { %814 = vrot.lane.b32.xlu1 %v813_v33, %s1463_s30  ;;  %809 = vrot.lane.b32.xlu2 %v723_v26, %s1465_s23  ;;  %s1153_s23 = sshll.u32 %s1554_s25, 3  ;;  %s961_s25 = scalar_lea.sflag [#allocation4], %s1632_s19 }
  0xd4   : > { %714 = vmatpush.bf16.msrb.mxu2 %v705_v6  ;;  %764 = vmatpush.bf16.msra.mxu0 %v705_v6  ;;  %s971_s10 = scalar_lea.hbm %s1803_s12, %s1153_s23 }
  0xd5   : > { %s975_s26 = sshll.u32 %s971_s10, 4  ;;  %s976_s26 = int_to_ptr.hbm [resolvable:$true] %s975_s26 }
  0xd6   : > { %s1398_s17 = sshra.s32 %s976_s26, 4  ;;  %s1399_s17 = int_to_ptr.hbm [resolvable:$true] %s1398_s17 }
  0xd7   : > { %1140 = vmatmul.msk.bf16.vlgmr.msrb.gmra.mxu1 %vm668_vm1, %v661_v16  ;;  %v638_v5 = vpop.f32.mrf.mxu0  ;;  %s1400_s20 = scalar_lea.hbm %s1399_s17, 8  ;;  %p1405_p10 = scmp.lt.s32.totalorder %s1399_s17, %s1803_s12 }
  0xd8   : > { %803 = vmatpush.bf16.msra.mxu2 %v794_v8  ;;  %784 = vmatpush.bf16.msra.mxu1 %v775_v31  ;;  %p1401_p1 = scmp.ne.s32.totalorder %s1399_s17, %s1400_s20  ;;  %p1406_p2 = scmp.lt.s32.totalorder %s1404_s11, %s1400_s20 }
  0xda   : > { %p1402_p4 = pnand %p1401_p1, %p1606_p7  ;;  %p1407_p11 = por %p1406_p2, %p1405_p10 }
  0xdc   : > { %p1403_p9 = pneg %p1402_p4 }
  0xde   : > { %p1408_p12 = pnand %p1407_p11, %p1403_p9 }
 0x125   : > { %v1697_v36 = vpop.permute.xlu2 %892 }
 0x12d   : > { %v810_v45 = vpop.permute.xlu2 %809 }
 0x13d   : > { %v725_v34 = vpop.permute.xlu1 %724 }
 0x13e   : > { %1142 = vmatmul.msk.bf16.vlgmr.msrb.gmra.mxu3 %vm668_vm1, %v725_v34 }
 0x145   : > { %v815_v40 = vpop.permute.xlu1 %814 }
 0x146   : > { %v820_v41 = vsel %vm668_vm1, %v815_v40, 0 }
 0x147   : > { %829 = vmatpush.bf16.xpose.msra.mxu3 %v820_v41 }
 0x14e   : > { %1146 = vmatmul.msk.bf16.vlgmr.msra.gmra.mxu3 %vm668_vm1, %v810_v45 }
 0x154   : > { %v684_v48 = vpop.f32.mrf.mxu1 }
 0x155   : > { %v685_v49 = vadd.f32 %v684_v48, %v1701_v47 }
 0x157   : > { %v688_v50 = vsel %vm668_vm1, %v685_v49, -inf }
 0x158   : > { %689 = vmax.xlane.f32.xlu0 %v688_v50 }
 0x15c   : > { %v686_v51 = vpop.f32.mrf.mxu1 }
 0x1c1   : > { %v738_v54 = vpop.f32.mrf.mxu3 }
 0x1c2   : > { %v739_v1 = vadd.f32 %v738_v54, %v1701_v47 }
 0x1c4   : > { %v742_v2 = vsel %vm668_vm1, %v739_v1, -inf }
 0x1c9   : > { %v740_v55 = vpop.f32.mrf.mxu3 }
 0x1cb   : > { %v690_v56 = vpop.xlane.xlu0 %689 }
 0x1cc   : > { %v691_v57 = vsub.f32 %v685_v49, %v690_v56  ;;  %v848_v49 = vunpack.c.l.b16 %v1718_v4 }
 0x1ce   : > { %v692_v58 = vmul.f32 1.442695, %v691_v57  ;;  %v849_v50 = vpack.c.b16 %v848_v49, %v848_v49 }
 0x1d0   : > { %1248 = vpow2.f32 %v692_v58 }
 0x1d1   : > { %v831_v59 = vpop.f32.mrf.mxu3 }
 0x1d2   : > { %v832_v60 = vadd.f32 %v831_v59, %v1701_v47 }
 0x1d4   : > { %v835_v61 = vsel %vm668_vm1, %v832_v60, -inf }
 0x1d5   : > { %836 = vmax.xlane.f32.xlu2 %v835_v61 }
 0x1d6   : > { %v1249_v62 = vpop.eup %1248 }
 0x1d7   : > { %v694_v63 = vsel %vm668_vm1, %v1249_v62, 0.0 }
 0x1d8   : > { %695 = vadd.xlane.f32.xlu0 %v694_v63 }
 0x1d9   : > { %v833_v0 = vpop.f32.mrf.mxu3 }
 0x1e0   : > { %743 = vmax.xlane.f32.xlu0 %v742_v2 }
 0x248   : > { %v837_v11 = vpop.xlane.xlu2 %836 }
 0x249   : > { %v838_v16 = vsub.f32 %v832_v60, %v837_v11  ;;  %v666_v60 = vld [vmem:[%s1798_s7 + $0x8] sm:$0xf] }
 0x24a   : > { %v876_v61 = vsel %vm703_vm6, %v666_v60, 0 }
 0x24b   : > { %v696_v9 = vpop.xlane.xlu0 %695  ;;  %v839_v18 = vmul.f32 1.442695, %v838_v16  ;;  %885 = vmatpush.bf16.msrb.mxu1 %v876_v61 }
 0x24c   : > { %1250 = vrcp.f32 %v696_v9 }
 0x252   : > { %v1251_v10 = vpop.eup %1250 }
 0x253   : > { %v698_v12 = vmul.f32 %v1251_v10, %v1249_v62  ;;  %v744_v13 = vpop.xlane.xlu0 %743  ;;  %v667_v62 = vld [vmem:[%s1798_s7 + $0xc] sm:$0xf] }
 0x254   : > { %v745_v14 = vsub.f32 %v739_v1, %v744_v13  ;;  %v943_v63 = vsel %vm703_vm6, %v667_v62, 0 }
 0x255   : > { %v699_v15 = vpack.c.bf16 %v698_v12, %v698_v12 }
 0x256   : > { %v746_v17 = vmul.f32 1.442695, %v745_v14 }
 0x257   : > { %1141 = vmatmul.msk.bf16.vlgmr.msrb.gmra.mxu2 %vm668_vm1, %v699_v15 }
 0x258   : > { %1252 = vpow2.f32 %v746_v17  ;;  %904 = vmatpush.bf16.xpose.msrb.mxu2 %v820_v41 }
 0x259   : > { %1254 = vpow2.f32 %v839_v18 }
 0x25e   : > { %v1253_v19 = vpop.eup %1252 }
 0x25f   : > { %v748_v20 = vsel %vm668_vm1, %v1253_v19, 0.0  ;;  %v1255_v21 = vpop.eup %1254 }
 0x260   : > { %749 = vadd.xlane.f32.xlu0 %v748_v20  ;;  %v841_v22 = vsel %vm668_vm1, %v1255_v21, 0.0 }
 0x268   : > { %842 = vadd.xlane.f32.xlu0 %v841_v22 }
 0x2d3   : > { %v750_v23 = vpop.xlane.xlu0 %749 }
 0x2d4   : > { %1256 = vrcp.f32 %v750_v23 }
 0x2da   : > { %v1257_v24 = vpop.eup %1256  ;;  %v716_v25 = vpop.f32.mrf.mxu2 }
 0x2db   : > { %v752_v26 = vmul.f32 %v1257_v24, %v1253_v19  ;;  %v720_v27 = vpack.c.bf16 %v716_v25, %v716_v25 }
 0x2dd   : > { %v753_v28 = vpack.c.bf16 %v752_v26, %v752_v26  ;;  %1145 = vmatmul.msk.bf16.vlgmr.msra.gmra.mxu2 %vm668_vm1, %v720_v27 }
 0x2df   : > { %1143 = vmatmul.msk.bf16.vlgmr.msra.gmra.mxu0 %vm668_vm1, %v753_v28 }
 0x2e2   : > { %v718_v29 = vpop.f32.mrf.mxu2 }
 0x2ed   : > { %1149 = vmatmul.msk.bf16.vlgmr.msrb.gmra.mxu2 %vm668_vm1, %v1697_v36 }
 0x35c   : > { %v766_v32 = vpop.f32.mrf.mxu0 }
 0x35d   : > { %v770_v33 = vpack.c.bf16 %v766_v32, %v766_v32 }
 0x35f   : > { %1144 = vmatmul.msk.bf16.vlgmr.msra.gmra.mxu1 %vm668_vm1, %v770_v33 }
 0x360   : > { %v805_v34 = vpop.f32.mrf.mxu2 }
 0x364   : > { %v768_v35 = vpop.f32.mrf.mxu0 }
 0x368   : > { %v807_v37 = vpop.f32.mrf.mxu2 }
 0x370   : > { %v906_v38 = vpop.f32.mrf.mxu2 }
 0x371   : > { %v907_v39 = vadd.f32 %v906_v38, %v1701_v47  ;;  %v843_v47 = vpop.xlane.xlu0 %842 }
 0x373   : > { %v910_v40 = vsel %vm668_vm1, %v907_v39, -inf }
 0x374   : > { %911 = vmax.xlane.f32.xlu1 %v910_v40 }
 0x378   : > { %v908_v36 = vpop.f32.mrf.mxu2 }
 0x3dc   : > { %v786_v41 = vpop.f32.mrf.mxu1 }
 0x3dd   : > { %v806_v7 = vadd.f32 %v805_v34, %v786_v41 }
 0x3e4   : > { %v788_v42 = vpop.f32.mrf.mxu1 }
 0x3e7   : > { %v912_v43 = vpop.xlane.xlu1 %911 }
 0x3e8   : > { %v913_v44 = vsub.f32 %v907_v39, %v912_v43 }
 0x3ea   : > { %v914_v45 = vmul.f32 1.442695, %v913_v44 }
 0x3ec   : > { %1258 = vpow2.f32 %v914_v45 }
 0x3ed   : > { %1260 = vrcp.f32 %v843_v47 }
 0x3f2   : > { %v1259_v46 = vpop.eup %1258 }
 0x3f3   : > { %v916_v48 = vsel %vm668_vm1, %v1259_v46, 0.0  ;;  %v1261_v52 = vpop.eup %1260 }
 0x3f4   : > { %917 = vadd.xlane.f32.xlu0 %v916_v48  ;;  %v845_v54 = vmul.f32 %v1261_v52, %v1255_v21 }
 0x3f6   : > { %v846_v58 = vpack.c.bf16 %v845_v54, %v845_v54 }
 0x408   : > { %850 = vrot.lane.b32.xlu0 %v849_v50, %s1463_s30 }
 0x467   : > { %v918_v51 = vpop.xlane.xlu0 %917 }
 0x468   : > { %1262 = vrcp.f32 %v918_v51 }
 0x46e   : > { %v1263_v53 = vpop.eup %1262 }
 0x46f   : > { %v920_v55 = vmul.f32 %v1263_v53, %v1259_v46 }
 0x471   : > { %v921_v59 = vpack.c.bf16 %v920_v55, %v920_v55 }
 0x47a   : > { %v851_v56 = vpop.permute.xlu0 %850 }
 0x47b   : > { %v856_v57 = vsel %vm703_vm6, %v851_v56, 0 }
 0x47c   : > { %865 = vmatpush.bf16.msrb.mxu0 %v856_v57  ;;  %932 = vmatpush.bf16.msrb.mxu3 %v856_v57 }
 0x47f   : > { %1147 = vmatmul.msk.bf16.vlgmr.msrb.gmra.mxu0 %vm668_vm1, %v846_v58  ;;  %1150 = vmatmul.msk.bf16.vlgmr.msrb.gmra.mxu3 %vm668_vm1, %v921_v59 }
 0x480   : > { %952 = vmatpush.bf16.msra.mxu0 %v943_v63 }
 0x4fc   : > { %v867_v0 = vpop.f32.mrf.mxu0 }
 0x4fd   : > { %v871_v1 = vpack.c.bf16 %v867_v0, %v867_v0 }
 0x4ff   : > { %1148 = vmatmul.msk.bf16.vlgmr.msrb.gmra.mxu1 %vm668_vm1, %v871_v1 }
 0x502   : > { %v934_v2 = vpop.f32.mrf.mxu3 }
 0x503   : > { %v938_v3 = vpack.c.bf16 %v934_v2, %v934_v2 }
 0x504   : > { %v869_v4 = vpop.f32.mrf.mxu0 }
 0x505   : > { %1151 = vmatmul.msk.bf16.vlgmr.msra.gmra.mxu0 %vm668_vm1, %v938_v3 }
 0x50a   : > { %v936_v5 = vpop.f32.mrf.mxu3 }
 0x57c   : > { %v887_v6 = vpop.f32.mrf.mxu1 }
 0x57d   : > { %v891_v8 = vadd.f32 %v887_v6, %v806_v7 }
 0x582   : > { %v954_v9 = vpop.f32.mrf.mxu0 }
 0x583   : > { %v958_v10 = vadd.f32 %v954_v9, %v891_v8 }
 0x584   : > { %v889_v11 = vpop.f32.mrf.mxu1 }
 0x585   : > { %959 = vst.msk [vmem:[%s483_s13] sm:$0xff] %vm507_vm0, %v958_v10 }
 0x586   : > { %1411 = shalt.err (!%p1408_p12)
}
 0x587   : > { %1180 = dma.vmem_to_hbm [thread:$0]  (%p1606_p7), %s974_s29, 128, %s976_s26, %s961_s25  }
 0x58a   : > { %v956_v12 = vpop.f32.mrf.mxu0 }
 0x58b PF: > { %s987_s19 = sand.u32 1, %s1446_s21   ;;  %p1818_p13 = scmp.ge.s32.totalorder %s1458_s24, 2 }
 0x58c   : > { %s988_s27 = scalar_lea.sflag [#allocation4], %s987_s19 }
 0x58d   : > { %p1197_p0 = pnand %p1818_p13, %p1568_p6 }
 0x58f   : > { %p1198_p3 = pneg %p1197_p0 }
 0x591   : > { %1441 = dma.done.wait (%p1198_p3), %s988_s27, 128  }
 0x592   : > { %1443 = vsyncadd (%p1198_p3), %s988_s27, 4294967168  ;;  %s1819_s14 = sld [smem:[#allocation15_spill]]  ;;  %p27_p5 = scmp.ge.s32.totalorder %s1592_s8, 4  }
 0x593   : > { %s1820_s23 = sld [smem:[#allocation16_spill]]  ;;  %s1821_s21 = smov %s1450_s22 }
 0x594   : > { %s1823_s24 = smov %s1592_s8  ;;  %29 = sbr.rel (!%p27_p5) target bundleno = 11 (0xb), region = 128 }
 0x598   : > { %s1822_s22 = smov %s1819_s14 }
 0x599   :  { %994 = vsyncpa [#allocation3], 1 }
 0x59a   :  { %996 = vsyncpa [#allocation3 + $0x1], 1 }
 0x59b   :  { %997 = vsyncpa [#allocation6], 1 }
 0x59c   :  { %998 = vsyncpa [#allocation9], 1 }
 0x59d   :  { %999 = vsyncpa [#allocation4], 1 }
 0x59e   :  { %1001 = vsyncpa [#allocation4 + $0x1], 1 }

</bundles_post_ra>
